<compile_context>
chip_gen: v5e
topology: v5e:2x2
jax: 0.10.0
libtpu: 0.0.40
codegen_flags: <defaults>
</compile_context>

<pallas_src>
import functools

import numpy as np

import jax
import jax.numpy as jnp
from jax.experimental import pallas as pl
from jax.experimental.pallas import tpu as pltpu


# ----------------------------- Pallas kernel --------------------------------

def _rope_cos_sin_kernel(pos_ref, inv_ref, cos_ref, sin_ref, *, half):
    # pos_ref: (seq_tile, 1)  positions for this (batch, seq-tile) block (sublane-major)
    # inv_ref: (1, half)      inverse frequencies (constant buffer)
    # cos_ref/sin_ref: (seq_tile, 2*half) outputs
    pos = pos_ref[...].astype(jnp.float32)      # (ts, 1)
    inv = inv_ref[...]                          # (1, half)
    freqs = pos * inv                           # (ts, half) outer product on the VPU

    cf = jnp.cos(freqs)                         # EUP, half-width only
    sf = jnp.sin(freqs)

    # emb = concat([freqs, freqs], -1)  ->  duplicate the half into both lanes groups.
    cos_ref[:, :half] = cf
    cos_ref[:, half:] = cf
    sin_ref[:, :half] = sf
    sin_ref[:, half:] = sf


# ----------------------------- wrapper ---------------------------------------

def _pick_seq_tile(S):
    # largest tile (<=1024) that divides S; else take the full (possibly ragged) dim.
    for t in (1024, 512, 256):
        if S % t == 0:
            return t
    return S


def gemma_rotary_embedding(position_ids, head_dim, base=1000.0, seq_tile=None):
    """Returns (cos, sin), each of shape (B, S, head_dim), float32.

    `x` in the torch module is only used for batch size / device, so it is not an
    input here; `position_ids` is (B, S) integer positions.
    """
    B, S = position_ids.shape
    half = head_dim // 2

    # Module buffer (computed once at init in torch; trivial host-side constant).
    inv_freq = 1.0 / (jnp.float32(base) **
                      (jnp.arange(0, head_dim, 2, dtype=jnp.float32) / head_dim))
    inv_freq = inv_freq.reshape(1, half)

    # Present positions sublane-major so the kernel needs no transpose.
    pos = position_ids.reshape(B, S, 1)

    if seq_tile is None:
        seq_tile = _pick_seq_tile(S)

    kernel = functools.partial(_rope_cos_sin_kernel, half=half)
    out_sd = jax.ShapeDtypeStruct((B, S, head_dim), jnp.float32)

    cos, sin = pl.pallas_call(
        kernel,
        out_shape=(out_sd, out_sd),
        grid=(B, S // seq_tile),
        in_specs=[
            pl.BlockSpec((None, seq_tile, 1), lambda b, s: (b, s, 0)),
            pl.BlockSpec((1, half), lambda b, s: (0, 0)),
        ],
        out_specs=(
            pl.BlockSpec((None, seq_tile, head_dim), lambda b, s: (b, s, 0)),
            pl.BlockSpec((None, seq_tile, head_dim), lambda b, s: (b, s, 0)),
        ),
        compiler_params=pltpu.CompilerParams(
            dimension_semantics=("parallel", "parallel")),
    )(pos, inv_freq)
    return cos, sin


# ----------------------------- main ------------------------------------------

if __name__ == "__main__":
    # Small but layout-realistic shapes: Gemma/PaliGemma uses head_dim = 256
    # (lane-dense, multiple of 128); batch=2, seq=8.
    B, S, head_dim = 2, 8, 256
    base = 10000.0   # value PaliGemma passes (module default is 1000)

    key = jax.random.PRNGKey(0)
    position_ids = jax.random.randint(key, (B, S), 0, 256, dtype=jnp.int32)

    cos, sin = gemma_rotary_embedding(position_ids, head_dim, base=base)
    cos, sin = jax.block_until_ready((cos, sin))

    # Pure-numpy reference mirroring the torch forward exactly.
    pid = np.asarray(position_ids).astype(np.float32)
    inv_freq_np = 1.0 / (base ** (np.arange(0, head_dim, 2, dtype=np.float32) / head_dim))
    freqs_np = pid[:, :, None] * inv_freq_np[None, None, :]
    emb_np = np.concatenate([freqs_np, freqs_np], axis=-1)

    assert cos.shape == (B, S, head_dim) and sin.shape == (B, S, head_dim)
    np.testing.assert_allclose(np.asarray(cos), np.cos(emb_np), rtol=1e-3, atol=1e-3)
    np.testing.assert_allclose(np.asarray(sin), np.sin(emb_np), rtol=1e-3, atol=1e-3)

    print("KERNEL_OK")
</pallas_src>

<mosaic_0001>
module attributes {stable_mosaic.version = 11 : i64} {
  func.func @_rope_cos_sin_kernel(%arg0: i32, %arg1: i32, %arg2: memref<1x8x1xi32, #tpu.memory_space<vmem>>, %arg3: memref<1x128xf32, #tpu.memory_space<vmem>>, %arg4: memref<1x8x256xf32, #tpu.memory_space<vmem>>, %arg5: memref<1x8x256xf32, #tpu.memory_space<vmem>>) attributes {dimension_semantics = [#tpu.dimension_semantics<parallel>, #tpu.dimension_semantics<parallel>], iteration_bounds = array<i64: 2, 1>, scalar_prefetch = 0 : i64, scratch_operands = 0 : i64, tpu.core_type = #tpu.core_type<tc>, window_params = [{transform_indices = @transform_0, window_bounds = array<i64: 1, 8, 1>}, {pipeline_mode = #tpu.pipeline_mode<synchronous>, transform_indices = @transform_1, window_bounds = array<i64: 1, 128>}, {transform_indices = @transform_2, window_bounds = array<i64: 1, 8, 256>}, {transform_indices = @transform_3, window_bounds = array<i64: 1, 8, 256>}]} {
    %c0 = arith.constant 0 : index
    %c0_0 = arith.constant 0 : index
    %c0_1 = arith.constant 0 : index
    %0 = vector.load %arg2[%c0, %c0_0, %c0_1] : memref<1x8x1xi32, #tpu.memory_space<vmem>>, vector<1x8x1xi32>
    %1 = vector.shape_cast %0 : vector<1x8x1xi32> to vector<8x1xi32>
    %2 = arith.sitofp %1 : vector<8x1xi32> to vector<8x1xf32>
    %c0_2 = arith.constant 0 : index
    %c0_3 = arith.constant 0 : index
    %3 = vector.load %arg3[%c0_2, %c0_3] : memref<1x128xf32, #tpu.memory_space<vmem>>, vector<1x128xf32>
    %4 = vector.broadcast %2 : vector<8x1xf32> to vector<8x128xf32>
    %5 = vector.broadcast %3 : vector<1x128xf32> to vector<8x128xf32>
    %6 = arith.mulf %4, %5 : vector<8x128xf32>
    %7 = math.cos %6 : vector<8x128xf32>
    %8 = math.sin %6 : vector<8x128xf32>
    %c0_4 = arith.constant 0 : index
    %c0_5 = arith.constant 0 : index
    %c0_6 = arith.constant 0 : index
    %9 = vector.load %arg4[%c0_4, %c0_5, %c0_6] : memref<1x8x256xf32, #tpu.memory_space<vmem>>, vector<1x8x128xf32>
    %10 = vector.shape_cast %9 : vector<1x8x128xf32> to vector<8x128xf32>
    %11 = vector.shape_cast %7 : vector<8x128xf32> to vector<1x8x128xf32>
    tpu.vector_store %arg4[%c0_4, %c0_5, %c0_6], %11 {strides = array<i32>} : memref<1x8x256xf32, #tpu.memory_space<vmem>>, vector<1x8x128xf32>,
    %c0_7 = arith.constant 0 : index
    %c0_8 = arith.constant 0 : index
    %c128 = arith.constant 128 : index
    %12 = vector.load %arg4[%c0_7, %c0_8, %c128] : memref<1x8x256xf32, #tpu.memory_space<vmem>>, vector<1x8x128xf32>
    %13 = vector.shape_cast %12 : vector<1x8x128xf32> to vector<8x128xf32>
    %14 = vector.shape_cast %7 : vector<8x128xf32> to vector<1x8x128xf32>
    tpu.vector_store %arg4[%c0_7, %c0_8, %c128], %14 {strides = array<i32>} : memref<1x8x256xf32, #tpu.memory_space<vmem>>, vector<1x8x128xf32>,
    %c0_9 = arith.constant 0 : index
    %c0_10 = arith.constant 0 : index
    %c0_11 = arith.constant 0 : index
    %15 = vector.load %arg5[%c0_9, %c0_10, %c0_11] : memref<1x8x256xf32, #tpu.memory_space<vmem>>, vector<1x8x128xf32>
    %16 = vector.shape_cast %15 : vector<1x8x128xf32> to vector<8x128xf32>
    %17 = vector.shape_cast %8 : vector<8x128xf32> to vector<1x8x128xf32>
    tpu.vector_store %arg5[%c0_9, %c0_10, %c0_11], %17 {strides = array<i32>} : memref<1x8x256xf32, #tpu.memory_space<vmem>>, vector<1x8x128xf32>,
    %c0_12 = arith.constant 0 : index
    %c0_13 = arith.constant 0 : index
    %c128_14 = arith.constant 128 : index
    %18 = vector.load %arg5[%c0_12, %c0_13, %c128_14] : memref<1x8x256xf32, #tpu.memory_space<vmem>>, vector<1x8x128xf32>
    %19 = vector.shape_cast %18 : vector<1x8x128xf32> to vector<8x128xf32>
    %20 = vector.shape_cast %8 : vector<8x128xf32> to vector<1x8x128xf32>
    tpu.vector_store %arg5[%c0_12, %c0_13, %c128_14], %20 {strides = array<i32>} : memref<1x8x256xf32, #tpu.memory_space<vmem>>, vector<1x8x128xf32>,
    return
  }
  func.func @transform_0(%arg0: i32, %arg1: i32) -> (i32, i32, i32) {
    %c0_i32 = arith.constant 0 : i32
    %c0_i32_0 = arith.constant 0 : i32
    return %arg0, %arg1, %c0_i32 : i32, i32, i32
  }
  func.func @transform_1(%arg0: i32, %arg1: i32) -> (i32, i32) {
    %c0_i32 = arith.constant 0 : i32
    %c0_i32_0 = arith.constant 0 : i32
    %c0_i32_1 = arith.constant 0 : i32
    return %c0_i32, %c0_i32_0 : i32, i32
  }
  func.func @transform_2(%arg0: i32, %arg1: i32) -> (i32, i32, i32) {
    %c0_i32 = arith.constant 0 : i32
    %c0_i32_0 = arith.constant 0 : i32
    return %arg0, %arg1, %c0_i32 : i32, i32, i32
  }
  func.func @transform_3(%arg0: i32, %arg1: i32) -> (i32, i32, i32) {
    %c0_i32 = arith.constant 0 : i32
    %c0_i32_0 = arith.constant 0 : i32
    return %arg0, %arg1, %c0_i32 : i32, i32, i32
  }
}

</mosaic_0001>

<bundles_post_ra>
// kernel: tpu_custom_call.1
= control target key start
LH: loop header
LB: loop body
LE: loop exit
PB: predicated region body
PF: predicated region fallthrough
CT: control target
= control target key end

     0   :  { %9 = vsyncpa [#allocation3], 0  ;;  %s1098_s0 = inlined_call_operand.vmem [shape: s32[2,8,1], index: 0, kind: input, shape index: {}]   ;;  %s1099_s1 = inlined_call_operand.vmem [shape: f32[1,128], index: 1, kind: input, shape index: {}]   ;;  %s1100_s2 = inlined_call_operand.hbm [shape: f32[2,8,256], index: 2, kind: output, shape index: {0}]   ;;  %s1101_s3 = inlined_call_operand.hbm [shape: f32[2,8,256], index: 3, kind: output, shape index: {1}]  }
   0x1   :  { %11 = vsyncpa [#allocation3 + $0x1], 0 }
   0x2   :  { %12 = vsyncpa [#allocation5], 0 }
   0x3   :  { %14 = vsyncpa [#allocation5 + $0x1], 0  ;;  %s911_s12 = smov 0   ;;  %s913_s13 = smov 0  }
   0x4   :  { %s915_s14 = smov 0   ;;  %s917_s15 = smov 0  }
   0x5   :  { %s919_s16 = smov 0   ;;  %s921_s17 = smov 0  }
   0x6 LB: > { %s679_s18 = sadd.s32 4294967295, %s882_s17   ;;  %s680_s19 = sadd.s32 4294967294, %s882_s17   ;;  %s882_s17 = sphi %s921_s17, %s20_s17   ;;  %s878_s16 = sphi %s919_s16, %s1108_s16   ;;  %s874_s15 = sphi %s917_s15, %s1107_s15   ;;  %s870_s14 = sphi %s915_s14, %s1106_s14   ;;  %s866_s13 = sphi %s913_s13, %s1105_s13   ;;  %s862_s12 = sphi %s911_s12, %s1104_s12  }
   0x7   : > { %s32_s20 = sadd.s32 1, %s878_s16  ;;  %s90_s21 = sadd.s32 1, %s870_s14 }
   0x8   : > { %p34_p0 = scmp.ge.s32.totalorder %s32_s20, 2  ;;  %p100_p1 = scmp.ne.s32.totalorder %s870_s14, %s866_s13 }
   0x9   : > { %p101_p2 = scmp.eq.s32.totalorder %s679_s18, 1  ;;  %p106_p3 = scmp.ne.s32.totalorder %s866_s13, %s862_s12 }
   0xa   : > { %s1110_s20 = smov (%p34_p0, %s32_s20), 0  ;;  %p107_p5 = scmp.eq.s32.totalorder %s680_s19, 1 }
   0xb   : > { %p951_p4 = por %p101_p2, %p100_p1  ;;  %s85_s23 = ssub.s32 %s878_s16, %s1110_s20 }
   0xc   : > { %p683_p6 = scmp.ge.s32.totalorder %s882_s17, 1  ;;  %p88_p7 = scmp.eq.s32.totalorder %s85_s23, 0 }
   0xd   : > { %p958_p8 = por %p107_p5, %p106_p3  ;;  %p166_p9 = scmp.lt.s32.totalorder %s882_s17, 3 }
   0xe   : > { %s964_s25 = scalar_select %p88_p7, %s870_s14, %s90_s21  }
   0xf   : > { %p167_p10 = pnand %p683_p6, %p166_p9 }
  0x10   : > { %p197_p11 = scmp.lt.s32.totalorder (!%p167_p10), %s874_s15, 1  ;;  %s1035_s6 = sand.u32 (!%p167_p10), 1, %s866_s13  }
  0x11   : > { %170 = sbr.rel (%p167_p10) target bundleno = 258 (0x102), region = 28  ;;  %s684_s7 = sshll.u32 (!%p167_p10), %s1035_s6, 4 }
  0x12   : > { %s701_s8 = sshll.u32 (!%p167_p10), %s874_s15, 4  ;;  %s189_s23 = scalar_lea.vmem (!%p167_p10), [#allocation2], %s684_s7 }
  0x13   : > { %s548_s11 = scalar_lea.hbm (!%p167_p10), %s1100_s2, %s701_s8  ;;  %s565_s21 = scalar_lea.hbm (!%p167_p10), %s1101_s3, %s701_s8 }
  0x14   : > { %s569_s29 = sshll.u32 (!%p167_p10), %s565_s21, 4  ;;  %s792_s9 = scalar_lea.hbm (!%p167_p10), %s1100_s2, 32  ;;  %s1049_s29 = int_to_ptr.hbm [resolvable:$true] %s569_s29 }
  0x16   : > { %v884_v0 = vmov 0   ;;  %s198_s26 = scalar_select %p197_p11, %s874_s15, 1  ;;  %v771_v3 = vld [vmem:[%s1099_s1] ss:$0 sm:$0xff]  ;;  %v885_v17 = vmov 683565275  }
  0x17   : > { %770 = vset.pattern.permute.xlu0 %v884_v0  ;;  %v886_v19 = vmov 2475754826   ;;  %v887_v22 = vmov 2131351028   ;;  %v888_v25 = vmov 2102212464  }
  0x18   : > { %s686_s27 = sshll.u32 %s198_s26, 3  ;;  %v889_v28 = vmov 920167782   ;;  %v890_v31 = vmov 1326507024   ;;  %s550_s15 = sshll.u32 %s189_s23, 4  ;;  %s551_s15 = int_to_ptr.vmem [resolvable:$true] %s550_s15 }
  0x19   : > { %s203_s30 = scalar_lea.vmem %s1098_s0, %s686_s27  ;;  %s552_s26 = sshll.u32 %s548_s11, 4  ;;  %s553_s26 = int_to_ptr.hbm [resolvable:$true] %s552_s26 }
  0x1a   : > { %v204_v1 = vld [vmem:[%s203_s30] sm:$0xff]  ;;  %s196_s27 = scalar_lea.vmem [#allocation4], %s684_s7  ;;  %s530_s30 = scalar_lea.sflag [#allocation3], %s1035_s6 }
  0x1b   : > { %v205_v2 = vcvt.s32.f32 %v204_v1  ;;  %s567_s28 = sshll.u32 %s196_s27, 4  ;;  %s786_s4 = sshra.s32 %s553_s26, 4  ;;  %s1047_s28 = int_to_ptr.vmem [resolvable:$true] %s567_s28  ;;  %s787_s4 = int_to_ptr.hbm [resolvable:$true] %s786_s4 }
  0x1c   : > { %s788_s5 = scalar_lea.hbm %s787_s4, 16  ;;  %p793_p1 = scmp.lt.s32.totalorder %s787_s4, %s1100_s2 }
  0x1d   : > { %209 = vperm.xlu0 %770, %v205_v2   ;;  %p789_p12 = scmp.ne.s32.totalorder %s787_s4, %s788_s5  ;;  %p794_p2 = scmp.lt.s32.totalorder %s792_s9, %s788_s5 }
  0x1f   : > { %p790_p13 = pnand %p789_p12, %p951_p4  ;;  %p795_p3 = por %p794_p2, %p793_p1 }
  0x21   : > { %p791_p0 = pneg %p790_p13 }
  0x23   : > { %p796_p5 = pnand %p795_p3, %p791_p0 }
  0x8f   : > { %v210_v4 = vpop.permute.xlu0 %209 }
  0x90   : > { %v975_v5 = vmul.f32 %v771_v3, %v210_v4 }
  0x92   : > { %v219_v6 = vand.u32 2139095040, %v975_v5  ;;  %v216_v9 = vand.u32 2147483647, %v975_v5  ;;  %vm218_vm12 = vcmp.lt.s32.totalorder %v975_v5, 0 }
  0x94   : > { %v220_v7 = vshrl.u32 %v219_v6, 23  ;;  %v223_v11 = vand.u32 8388607, %v216_v9  ;;  %vm217_vm13 = vcmp.le.f32.partialorder %v216_v9, 0.7853982 }
  0x96   : > { %v687_v8 = vadd.s32 4294967169, %v220_v7  ;;  %v224_v15 = vor.u32 8388608, %v223_v11 }
  0x98   : > { %v226_v10 = vadd.s32 1, %v687_v8  ;;  %v992_v38 = vshll.u32 %v224_v15, 8 }
  0x9a   : > { %vm227_vm0 = vcmp.gt.s32.totalorder %v226_v10, 0  ;;  %v265_v47 = vand.u32 65535, %v992_v38  ;;  %v266_v48 = vshrl.u32 %v992_v38, 16 }
  0x9b   : > { %v228_v12 = vsel %vm227_vm0, %v226_v10, 0 }
  0x9c   : > { %v230_v13 = vand.u32 31, %v228_v12  ;;  %v983_v16 = vshrl.u32 %v228_v12, 5 }
  0x9e   : > { %v981_v14 = vsub.s32 32, %v230_v13  ;;  %v233_v18 = vshll.u32 %v885_v17, %v230_v13  ;;  %v236_v20 = vshll.u32 %v886_v19, %v230_v13  ;;  %v239_v24 = vshll.u32 %v887_v22, %v230_v13 }
  0x9f   : > { %v242_v27 = vshll.u32 %v888_v25, %v230_v13  ;;  %v245_v30 = vshll.u32 %v889_v28, %v230_v13  ;;  %vm248_vm1 = vcmp.lt.s32.totalorder %v983_v16, 1  ;;  %vm251_vm2 = vcmp.lt.s32.totalorder %v983_v16, 4 }
  0xa0   : > { %v234_v21 = vshrl.u32 %v886_v19, %v981_v14  ;;  %v237_v23 = vshrl.u32 %v887_v22, %v981_v14  ;;  %v240_v26 = vshrl.u32 %v888_v25, %v981_v14  ;;  %v243_v29 = vshrl.u32 %v889_v28, %v981_v14 }
  0xa1   : > { %v246_v32 = vshrl.u32 %v890_v31, %v981_v14  ;;  %vm250_vm3 = vcmp.lt.s32.totalorder %v983_v16, 3  ;;  %vm249_vm4 = vcmp.lt.s32.totalorder %v983_v16, 2  ;;  %v232_v12 = vshrl.u32 %v885_v17, %v981_v14 }
  0xa2   : > { %v235_v33 = vor.u32 %v234_v21, %v233_v18  ;;  %v238_v34 = vor.u32 %v237_v23, %v236_v20  ;;  %v241_v35 = vor.u32 %v240_v26, %v239_v24  ;;  %v244_v36 = vor.u32 %v243_v29, %v242_v27 }
  0xa3   : > { %v247_v37 = vor.u32 %v246_v32, %v245_v30 }
  0xa4   : > { %v256_v39 = vsel %vm248_vm1, %v235_v33, %v238_v34  ;;  %v260_v40 = vsel %vm248_vm1, %v238_v34, %v241_v35  ;;  %v257_v41 = vsel %vm251_vm2, %v244_v36, 920167782  ;;  %v253_v8 = vsel %vm251_vm2, %v241_v35, 2102212464 }
  0xa5   : > { %v261_v42 = vsel %vm251_vm2, %v247_v37, 1326507024  ;;  %v258_v43 = vsel %vm250_vm3, %v241_v35, %v257_v41  ;;  %v252_v21 = vsel %vm248_vm1, %v232_v12, %v235_v33  ;;  %v254_v22 = vsel %vm250_vm3, %v238_v34, %v253_v8 }
  0xa6   : > { %v262_v44 = vsel %vm250_vm3, %v244_v36, %v261_v42  ;;  %v259_v45 = vsel %vm249_vm4, %v256_v39, %v258_v43  ;;  %v255_v14 = vsel %vm249_vm4, %v252_v21, %v254_v22 }
  0xa7   : > { %v263_v46 = vsel %vm249_vm4, %v260_v40, %v262_v44  ;;  %v289_v51 = vand.u32 65535, %v259_v45  ;;  %v290_v52 = vshrl.u32 %v259_v45, 16  ;;  %v309_v29 = vmul.u32 %v992_v38, %v255_v14 }
  0xa8   : > { %v267_v49 = vand.u32 65535, %v263_v46  ;;  %v268_v50 = vshrl.u32 %v263_v46, 16  ;;  %vm359_vm4 = vweird.f32 %v975_v5 }
  0xa9   : > { %v292_v55 = vmul.u32 %v290_v52, %v265_v47  ;;  %v293_v56 = vmul.u32 %v289_v51, %v266_v48  ;;  %v291_v60 = vmul.u32 %v289_v51, %v265_v47  ;;  %v294_v1 = vmul.u32 %v290_v52, %v266_v48 }
  0xaa   : > { %v270_v53 = vmul.u32 %v268_v50, %v265_v47  ;;  %v271_v54 = vmul.u32 %v267_v49, %v266_v48  ;;  %v269_v57 = vmul.u32 %v267_v49, %v265_v47  ;;  %v272_v59 = vmul.u32 %v268_v50, %v266_v48 }
  0xab   : > { %v295_v61 = vshll.u32 %v292_v55, 16  ;;  %v297_v3 = vshll.u32 %v293_v56, 16  ;;  %v296_v19 = vshrl.u32 %v292_v55, 16  ;;  %v298_v25 = vshrl.u32 %v293_v56, 16 }
  0xac   : > { %v273_v58 = vshll.u32 %v270_v53, 16  ;;  %v275_v62 = vshll.u32 %v271_v54, 16  ;;  %v274_v13 = vshrl.u32 %v270_v53, 16  ;;  %v276_v23 = vshrl.u32 %v271_v54, 16 }
  0xad   : > { %vm299_vm6 = vc.u32 %v291_v60, %v295_v61  ;;  %v301_v4 = vadd.s32 %v295_v61, %v291_v60 }
  0xae   : > { %vm277_vm5 = vc.u32 %v269_v57, %v273_v58  ;;  %v279_v63 = vadd.s32 %v273_v58, %v269_v57  ;;  %v300_v7 = vsel %vm299_vm6, 1, %v884_v0 }
  0xaf   : > { %v278_v2 = vsel %vm277_vm5, 1, %v884_v0  ;;  %v302_v11 = vadd.s32 %v300_v7, %v294_v1  ;;  %vm303_vm8 = vc.u32 %v301_v4, %v297_v3  ;;  %v305_v28 = vadd.s32 %v301_v4, %v297_v3 }
  0xb0   : > { %v280_v6 = vadd.s32 %v278_v2, %v272_v59  ;;  %vm281_vm7 = vc.u32 %v279_v63, %v275_v62  ;;  %v304_v18 = vsel %vm303_vm8, 1, %v884_v0 }
  0xb1   : > { %v282_v10 = vsel %vm281_vm7, 1, %v884_v0  ;;  %v306_v20 = vadd.s32 %v304_v18, %v302_v11 }
  0xb2   : > { %v284_v15 = vadd.s32 %v282_v10, %v280_v6 }
  0xb3   : > { %v307_v26 = vadd.s32 %v306_v20, %v296_v19 }
  0xb4   : > { %v285_v24 = vadd.s32 %v284_v15, %v274_v13 }
  0xb5   : > { %v308_v17 = vadd.s32 %v307_v26, %v298_v25 }
  0xb6   : > { %v286_v27 = vadd.s32 %v285_v24, %v276_v23 }
  0xb7   : > { %v312_v0 = vadd.s32 1, %v308_v17 }
  0xb8   : > { %vm311_vm9 = vc.u32 %v286_v27, %v305_v28  ;;  %v310_v16 = vadd.s32 %v305_v28, %v286_v27 }
  0xb9   : > { %v313_v30 = vsel %vm311_vm9, %v312_v0, %v308_v17 }
  0xba   : > { %v314_v31 = vadd.s32 %v313_v30, %v309_v29 }
  0xbc   : > { %v315_v32 = vadd.s32 536870912, %v314_v31 }
  0xbe   : > { %v316_v33 = vshrl.u32 %v315_v32, 30 }
  0xc0   : > { %v317_v35 = vshll.u32 %v316_v33, 30  ;;  %v340_v54 = vsub.s32 4, %v316_v33 }
  0xc2   : > { %v318_v34 = vsub.s32 %v314_v31, %v317_v35  ;;  %v341_v59 = vsel %vm218_vm12, %v340_v54, %v316_v33 }
  0xc3   : > { %v343_v63 = vsel %vm217_vm13, 0, %v341_v59 }
  0xc4   : > { %vm319_vm10 = vcmp.lt.s32.totalorder %v318_v34, 0  ;;  %v320_v36 = vsub.s32 0, %v318_v34  ;;  %v514_v9 = vadd.s32 3, %v343_v63  ;;  %v360_v10 = vand.u32 3, %v343_v63 }
  0xc6   : > { %v321_v37 = vsel %vm319_vm10, %v320_v36, %v318_v34  ;;  %v515_v11 = vand.u32 3, %v514_v9  ;;  %vm361_vm14 = vcmp.lt.s32.totalorder %v360_v10, 2  ;;  %vm362_vm15 = vcmp.eq.s32.totalorder %v360_v10, 0 }
  0xc7   : > { %v322_v39 = vclz %v321_v37  ;;  %vm365_vm0 = vcmp.eq.s32.totalorder %v360_v10, 2 }
  0xc8   : > { %vm516_vm1 = vcmp.lt.s32.totalorder %v515_v11, 2  ;;  %vm517_vm2 = vcmp.eq.s32.totalorder %v515_v11, 0  ;;  %vm520_vm3 = vcmp.eq.s32.totalorder %v515_v11, 2 }
  0xc9   : > { %v688_v40 = vadd.s32 4294967294, %v322_v39 }
  0xcb   : > { %vm689_vm11 = vcmp.lt.s32.totalorder %v688_v40, 0 }
  0xcc   : > { %v325_v41 = vsel %vm689_vm11, 0, %v688_v40 }
  0xcd   : > { %v326_v42 = vsub.s32 32, %v325_v41  ;;  %v330_v43 = vsub.s32 4294967266, %v325_v41  ;;  %v327_v44 = vshll.u32 %v318_v34, %v325_v41 }
  0xcf   : > { %v328_v45 = vshrl.u32 %v310_v16, %v326_v42  ;;  %v331_v46 = vadd.s32 127, %v330_v43 }
  0xd1   : > { %v329_v38 = vor.u32 %v328_v45, %v327_v44  ;;  %v332_v47 = vshll.u32 %v331_v46, 23 }
  0xd3   : > { %v333_v48 = vor.u32 4788187, %v332_v47  ;;  %v336_v50 = vcvt.s32.f32 %v329_v38 }
  0xd5   : > { %v334_v49 = vand.u32 2147483647, %v333_v48 }
  0xd7   : > { %v337_v51 = vmul.f32 %v336_v50, %v334_v49 }
  0xd9   : > { %v338_v52 = vxor.u32 2147483648, %v337_v51 }
  0xdb   : > { %v339_v53 = vsel %vm218_vm12, %v338_v52, %v337_v51 }
  0xdc   : > { %v342_v55 = vsel %vm217_vm13, %v975_v5, %v339_v53 }
  0xdd   : > { %v344_v56 = vmul.f32 %v342_v55, %v342_v55 }
  0xdf   : > { %v352_v57 = vmul.f32 -0.00019511016, %v344_v56  ;;  %v345_v58 = vmul.f32 -0.001358992, %v344_v56 }
  0xe1   : > { %v353_v60 = vadd.f32 0.008332121, %v352_v57  ;;  %v346_v61 = vadd.f32 0.041655596, %v345_v58 }
  0xe3   : > { %v354_v62 = vmul.f32 %v353_v60, %v344_v56  ;;  %v347_v1 = vmul.f32 %v346_v61, %v344_v56 }
  0xe5   : > { %v355_v2 = vadd.f32 -0.16666654, %v354_v62  ;;  %v348_v3 = vadd.f32 -0.4999988, %v347_v1 }
  0xe7   : > { %v356_v4 = vmul.f32 %v355_v2, %v344_v56  ;;  %v349_v6 = vmul.f32 %v348_v3, %v344_v56 }
  0xe9   : > { %v357_v7 = vadd.f32 1.0, %v356_v4  ;;  %v350_v8 = vadd.f32 1.0, %v349_v6 }
  0xeb   : > { %v358_v12 = vmul.f32 %v357_v7, %v342_v55  ;;  %v366_v13 = vxor.u32 2147483648, %v350_v8 }
  0xed   : > { %v363_v15 = vxor.u32 2147483648, %v358_v12  ;;  %v367_v19 = vsel %vm365_vm0, %v366_v13, %v358_v12  ;;  %v522_v21 = vsel %vm520_vm3, %v366_v13, %v358_v12 }
  0xef   : > { %v364_v18 = vsel %vm362_vm15, %v350_v8, %v363_v15  ;;  %v519_v20 = vsel %vm517_vm2, %v350_v8, %v363_v15 }
  0xf0   : > { %v368_v22 = vsel %vm361_vm14, %v364_v18, %v367_v19  ;;  %v523_v23 = vsel %vm516_vm1, %v519_v20, %v522_v21 }
  0xf1   : > { %v369_v24 = vsel %vm359_vm4, nan, %v368_v22  ;;  %v524_v25 = vsel %vm359_vm4, nan, %v523_v23 }
  0xf2   : > { %525 = vst [vmem:[%s189_s23] sm:$0xff] %v369_v24 }
  0xf3   : > { %526 = vst [vmem:[%s189_s23 + $0x8] sm:$0xff] %v369_v24 }
  0xf4   : > { %799 = shalt.err (!%p796_p5)
}
  0xf5   : > { %703 = dma.vmem_to_hbm [thread:$0]  (%p951_p4), %s551_s15, 256, %s553_s26, %s530_s30   ;;  %527 = vst [vmem:[%s196_s27] sm:$0xff] %v524_v25 }
  0xf6   : > { %528 = vst [vmem:[%s196_s27 + $0x8] sm:$0xff] %v524_v25  ;;  %s535_s18 = scalar_lea.sflag [#allocation5], %s1035_s6  ;;  %s814_s19 = sshra.s32 %s1049_s29, 4  ;;  %s815_s19 = int_to_ptr.hbm [resolvable:$true] %s814_s19 }
  0xf7   : > { %s816_s21 = scalar_lea.hbm %s815_s19, 16  ;;  %s820_s5 = scalar_lea.hbm %s1101_s3, 32 }
  0xf8   : > { %p817_p6 = scmp.ne.s32.totalorder %s815_s19, %s816_s21  ;;  %p821_p10 = scmp.lt.s32.totalorder %s815_s19, %s1101_s3 }
  0xf9   : > { %p822_p11 = scmp.lt.s32.totalorder %s820_s5, %s816_s21 }
  0xfa   : > { %p818_p7 = pnand %p817_p6, %p951_p4 }
  0xfb   : > { %p823_p12 = por %p822_p11, %p821_p10 }
  0xfc   : > { %p819_p9 = pneg %p818_p7 }
  0xfe   : > { %p824_p13 = pnand %p823_p12, %p819_p9 }
 0x100   : > { %827 = shalt.err (!%p824_p13)
}
 0x101   : > { %704 = dma.vmem_to_hbm [thread:$0]  (%p951_p4), %s1047_s28, 256, %s1049_s29, %s535_s18  }
 0x102 PF: > { %p714_p0 = scmp.ge.s32.totalorder %s882_s17, 2  ;;  %s581_s6 = sand.u32 1, %s862_s12  }
 0x103   : > { %s582_s15 = scalar_lea.sflag [#allocation3], %s581_s6 }
 0x104   : > { %p708_p1 = pnand %p714_p0, %p958_p8 }
 0x106   : > { %p709_p2 = pneg %p708_p1 }
 0x108   : > { %853 = dma.done.wait (%p709_p2), %s582_s15, 256  }
 0x109   : > { %855 = vsyncadd (%p709_p2), %s582_s15, 4294967040  ;;  %s592_s26 = scalar_lea.sflag [#allocation5], %s581_s6 }
 0x10a   : > { %857 = dma.done.wait (%p709_p2), %s592_s26, 256  }
 0x10b   : > { %859 = vsyncadd (%p709_p2), %s592_s26, 4294967040  ;;  %s20_s17 = sadd.s32 1, %s882_s17   ;;  %s1104_s12 = smov %s866_s13 }
 0x10c   : > { %p17_p3 = scmp.ge.s32.totalorder %s20_s17, 4   ;;  %s1105_s13 = smov %s870_s14 }
 0x10d   : > { %s1106_s14 = smov %s964_s25  ;;  %s1107_s15 = smov %s878_s16 }
 0x10e   : > { %s1108_s16 = smov %s1110_s20  ;;  %19 = sbr.rel (!%p17_p3) target bundleno = 6 (0x6), region = 80 }
 0x113   :  { %598 = vsyncpa [#allocation3], 1 }
 0x114   :  { %600 = vsyncpa [#allocation3 + $0x1], 1 }
 0x115   :  { %601 = vsyncpa [#allocation5], 1 }
 0x116   :  { %603 = vsyncpa [#allocation5 + $0x1], 1 }

</bundles_post_ra>
